<compile_context>
chip_gen: v7x
topology: tpu7x:2x2x1
jax: 0.10.0
libtpu: 0.0.40
codegen_flags: <defaults>
</compile_context>

<pallas_src>
import functools

import jax
import jax.numpy as jnp
from jax import lax
from jax.experimental import pallas as pl
from jax.experimental.pallas import tpu as pltpu


_NEG_BIG = -1e30  # padded-lane bias value; exp() of it underflows to 0 in reductions


def _round_up(n, m):
    return ((n + m - 1) // m) * m


def _classifier_kernel(x_ref, w_ref, b_ref, o_ref, *, activation):
    # x_ref: (TM, C); w_ref: (Kp, C); b_ref: (1, Kp); o_ref: (TM, Kp)
    # Contract the C axis of both operands (MXU handles either orientation),
    # accumulate in f32.
    z = lax.dot_general(
        x_ref[...], w_ref[...],
        dimension_numbers=(((1,), (1,)), ((), ())),
        preferred_element_type=jnp.float32,
    )
    z = z + b_ref[...]  # bias is f32; padded lanes are ~-1e30

    if activation == "LogSigmoid":
        # single-exp numerically stable form: min(z, 0) - log1p(exp(-|z|))
        out = jnp.minimum(z, 0.0) - jnp.log1p(jnp.exp(-jnp.abs(z)))
    elif activation == "LogSoftmax":
        m = jnp.max(z, axis=-1, keepdims=True)
        s = z - m
        lse = jnp.log(jnp.sum(jnp.exp(s), axis=-1, keepdims=True))
        out = s - lse
    elif activation == "Sigmoid":
        out = 1.0 / (1.0 + jnp.exp(-z))
    elif activation == "Softmax":
        m = jnp.max(z, axis=-1, keepdims=True)
        e = jnp.exp(z - m)
        out = e * pl.reciprocal(jnp.sum(e, axis=-1, keepdims=True), approx=True)
    elif activation == "Softsign":
        out = z / (1.0 + jnp.abs(z))
    elif activation == "Tanh":
        out = jnp.tanh(z)
    else:
        raise ValueError(f"unknown activation {activation}")

    o_ref[...] = out.astype(o_ref.dtype)


def cnn_classifier_forward(x, weight, bias, *, final_activation="LogSoftmax",
                           compute_dtype=None):
    """x: (B, in_channels); weight: (class_num, in_channels); bias: (class_num,).

    compute_dtype: optionally cast x / weight (e.g. jnp.bfloat16 on v6e/v7x) before
    the matmul; accumulation and activation math stay in float32.
    """
    B, C = x.shape
    K, C2 = weight.shape
    assert C == C2, "weight must be (class_num, in_channels)"
    out_dtype = x.dtype

    # --- pad class dim to a lane-dense multiple of 128 ------------------------
    Kp = _round_up(K, 128)
    w_p = weight if Kp == K else jnp.pad(weight, ((0, Kp - K), (0, 0)))
    b_p = bias if Kp == K else jnp.pad(bias, (0, Kp - K), constant_values=_NEG_BIG)
    b2 = b_p.reshape(1, Kp).astype(jnp.float32)

    # --- tile the batch dim ----------------------------------------------------
    in_dtype = compute_dtype if compute_dtype is not None else x.dtype
    itemsize = jnp.dtype(in_dtype).itemsize
    tm_cap = 512
    # keep the double-buffered x tile comfortably inside scoped VMEM (v7x: 64 MiB phys)
    while tm_cap > 8 and 2 * tm_cap * C * itemsize > (16 << 20):
        tm_cap //= 2
    TM = min(_round_up(B, 8), tm_cap)
    B_pad = _round_up(B, TM)
    x_p = x if B_pad == B else jnp.pad(x, ((0, B_pad - B), (0, 0)))

    if compute_dtype is not None:
        x_p = x_p.astype(compute_dtype)
        w_p = w_p.astype(compute_dtype)

    kernel = functools.partial(_classifier_kernel, activation=final_activation)

    cost = pl.CostEstimate(
        flops=2 * B_pad * C * Kp,
        transcendentals=B_pad * Kp,
        bytes_accessed=(x_p.size * x_p.dtype.itemsize
                        + w_p.size * w_p.dtype.itemsize
                        + b2.size * 4
                        + B_pad * Kp * jnp.dtype(out_dtype).itemsize),
    )

    out = pl.pallas_call(
        kernel,
        out_shape=jax.ShapeDtypeStruct((B_pad, Kp), out_dtype),
        grid=(B_pad // TM,),
        in_specs=[
            pl.BlockSpec((TM, C), lambda i: (i, 0)),   # batch tile moves with grid
            pl.BlockSpec((Kp, C), lambda i: (0, 0)),   # weight resident
            pl.BlockSpec((1, Kp), lambda i: (0, 0)),   # bias resident
        ],
        out_specs=pl.BlockSpec((TM, Kp), lambda i: (i, 0)),
        compiler_params=pltpu.CompilerParams(
            dimension_semantics=("parallel",),  # shard batch tiles across TCs (v7x)
        ),
        cost_estimate=cost,
    )(x_p, w_p, b2)

    # slice off batch / class padding
    return out[:B, :K]


def init_params(key, in_channels, class_num):
    # torch.nn.init.xavier_uniform_ on weight of shape (class_num, in_channels)
    limit = jnp.sqrt(6.0 / (in_channels + class_num))
    weight = jax.random.uniform(
        key, (class_num, in_channels), dtype=jnp.float32, minval=-limit, maxval=limit
    )
    bias = jnp.full((class_num,), 0.01, dtype=jnp.float32)  # bias.data.fill_(0.01)
    return weight, bias


if __name__ == "__main__":
    in_channels = 32
    class_num = 10
    batch = 8
    final_activation = "LogSoftmax"

    key = jax.random.PRNGKey(0)
    kx, kw = jax.random.split(key)
    x = jax.random.normal(kx, (batch, in_channels), dtype=jnp.float32)
    weight, bias = init_params(kw, in_channels, class_num)

    out = cnn_classifier_forward(x, weight, bias, final_activation=final_activation)
    out = jax.block_until_ready(out)

    assert out.shape == (batch, class_num)

    # reference check against the plain-JAX forward (Linear + LogSoftmax)
    ref = jax.nn.log_softmax(x @ weight.T + bias, axis=-1)
    assert bool(jnp.allclose(out, ref, atol=1e-4, rtol=1e-4))

    # log-softmax rows should exponentiate-sum to ~1
    row_sums = jnp.sum(jnp.exp(out), axis=-1)
    assert bool(jnp.all(jnp.abs(row_sums - 1.0) < 1e-4))

    print("KERNEL_OK")
</pallas_src>

<mosaic_0001>
module attributes {stable_mosaic.version = 11 : i64} {
  func.func @_classifier_kernel(%arg0: i32, %arg1: memref<8x32xf32, #tpu.memory_space<vmem>>, %arg2: memref<128x32xf32, #tpu.memory_space<vmem>>, %arg3: memref<1x128xf32, #tpu.memory_space<vmem>>, %arg4: memref<8x128xf32, #tpu.memory_space<vmem>>) attributes {dimension_semantics = [#tpu.dimension_semantics<parallel>], iteration_bounds = array<i64: 1>, scalar_prefetch = 0 : i64, scratch_operands = 0 : i64, tpu.core_type = #tpu.core_type<tc>, window_params = [{transform_indices = @transform_0, window_bounds = array<i64: 8, 32>}, {pipeline_mode = #tpu.pipeline_mode<synchronous>, transform_indices = @transform_1, window_bounds = array<i64: 128, 32>}, {pipeline_mode = #tpu.pipeline_mode<synchronous>, transform_indices = @transform_2, window_bounds = array<i64: 1, 128>}, {transform_indices = @transform_3, window_bounds = array<i64: 8, 128>}]} {
    %c0 = arith.constant 0 : index
    %c0_0 = arith.constant 0 : index
    %0 = vector.load %arg1[%c0, %c0_0] : memref<8x32xf32, #tpu.memory_space<vmem>>, vector<8x32xf32>
    %c0_1 = arith.constant 0 : index
    %c0_2 = arith.constant 0 : index
    %1 = vector.load %arg2[%c0_1, %c0_2] : memref<128x32xf32, #tpu.memory_space<vmem>>, vector<128x32xf32>
    %cst = arith.constant dense<0.000000e+00> : vector<8x128xf32>
    %2 = tpu.matmul %0, %1, %cst {dimension_numbers = #tpu.dot_dimension_numbers<[1], [1], [0], [0], [0, 0, 1, 0], [], []>} : vector<8x32xf32>, vector<128x32xf32>, vector<8x128xf32> -> vector<8x128xf32>
    %c0_3 = arith.constant 0 : index
    %c0_4 = arith.constant 0 : index
    %3 = vector.load %arg3[%c0_3, %c0_4] : memref<1x128xf32, #tpu.memory_space<vmem>>, vector<1x128xf32>
    %4 = vector.broadcast %3 : vector<1x128xf32> to vector<8x128xf32>
    %5 = arith.addf %2, %4 : vector<8x128xf32>
    %cst_5 = arith.constant dense<0xFF800000> : vector<8xf32>
    %6 = vector.multi_reduction <maximumf>, %5, %cst_5 [1] : vector<8x128xf32> to vector<8xf32>
    %7 = vector.shape_cast %6 : vector<8xf32> to vector<8x1xf32>
    %8 = vector.broadcast %7 : vector<8x1xf32> to vector<8x128xf32>
    %9 = arith.subf %5, %8 : vector<8x128xf32>
    %10 = math.exp %9 : vector<8x128xf32>
    %cst_6 = arith.constant dense<0.000000e+00> : vector<8xf32>
    %11 = vector.multi_reduction <add>, %10, %cst_6 [1] : vector<8x128xf32> to vector<8xf32>
    %12 = vector.shape_cast %11 : vector<8xf32> to vector<8x1xf32>
    %13 = math.log %12 : vector<8x1xf32>
    %14 = vector.broadcast %13 : vector<8x1xf32> to vector<8x128xf32>
    %15 = arith.subf %9, %14 : vector<8x128xf32>
    %c0_7 = arith.constant 0 : index
    %c0_8 = arith.constant 0 : index
    %16 = vector.load %arg4[%c0_7, %c0_8] : memref<8x128xf32, #tpu.memory_space<vmem>>, vector<8x128xf32>
    tpu.vector_store %arg4[%c0_7, %c0_8], %15 {strides = array<i32>} : memref<8x128xf32, #tpu.memory_space<vmem>>, vector<8x128xf32>,
    return
  }
  func.func @transform_0(%arg0: i32) -> (i32, i32) {
    %c0_i32 = arith.constant 0 : i32
    %c0_i32_0 = arith.constant 0 : i32
    return %arg0, %c0_i32 : i32, i32
  }
  func.func @transform_1(%arg0: i32) -> (i32, i32) {
    %c0_i32 = arith.constant 0 : i32
    %c0_i32_0 = arith.constant 0 : i32
    %c0_i32_1 = arith.constant 0 : i32
    return %c0_i32, %c0_i32_0 : i32, i32
  }
  func.func @transform_2(%arg0: i32) -> (i32, i32) {
    %c0_i32 = arith.constant 0 : i32
    %c0_i32_0 = arith.constant 0 : i32
    %c0_i32_1 = arith.constant 0 : i32
    return %c0_i32, %c0_i32_0 : i32, i32
  }
  func.func @transform_3(%arg0: i32) -> (i32, i32) {
    %c0_i32 = arith.constant 0 : i32
    %c0_i32_0 = arith.constant 0 : i32
    return %arg0, %c0_i32 : i32, i32
  }
}

</mosaic_0001>

<bundles_post_ra>
// kernel: tpu_custom_call.1
= control target key start
LH: loop header
LB: loop body
LE: loop exit
PB: predicated region body
PF: predicated region fallthrough
CT: control target
= control target key end

     0   :  { %vm39_vm0 = vcmask 261120   ;;  %v320_v2 = vmov 0.0|0.0   ;;  %vm321_vm2 = vmmov 0   ;;  %v322_v5 = vmov 0.0   ;;  %s433_s0 = inlined_call_operand.vmem [shape: f32[8,32], index: 0, kind: input, shape index: {}]   ;;  %s434_s1 = inlined_call_operand.vmem [shape: f32[128,32], index: 1, kind: input, shape index: {}]   ;;  %s435_s2 = inlined_call_operand.vmem [shape: f32[1,128], index: 2, kind: input, shape index: {}]   ;;  %s436_s3 = inlined_call_operand.hbm [shape: f32[8,128], index: 3, kind: output, shape index: {}]  }
   0x1   :  { %v16_v0 = vld [vmem:[%s434_s1] sm:$0xff]  ;;  %v17_v1 = vld [vmem:[%s434_s1 + $0x8] sm:$0xff]  ;;  %256 = vmatprep.subr.bf16.mxu0 %v320_v2  ;;  %vm352_vm1 = vmpackc.low %vm39_vm0, %vm39_vm0  ;;  %253 = vmatprep.mubr.msk.f32.mxu0 %vm321_vm2, %v322_v5 }
   0x2   :  { %v257_v3 = vpack.c.bf16 %v17_v1, %v16_v0  ;;  %v18_v6 = vld [vmem:[%s434_s1 + $0x10] sm:$0xff]  ;;  %v19_v7 = vld [vmem:[%s434_s1 + $0x18] sm:$0xff] }
   0x4   :  { %259 = vmatpush3.bf16.xpose.msk.msra.mxu0 %vm352_vm1, %v257_v3 }
   0x5   :  { %260 = vmatprep.subr.bf16.mxu0 %v320_v2 }
   0x6   :  { %8 = vsyncpa [#allocation3], 0  ;;  %v261_v8 = vpack.c.bf16 %v19_v7, %v18_v6  ;;  %v20_v9 = vld [vmem:[%s434_s1 + $0x20] sm:$0xff]  ;;  %v21_v10 = vld [vmem:[%s434_s1 + $0x28] sm:$0xff] }
   0x7   :  { %v265_v11 = vpack.c.bf16 %v21_v10, %v20_v9  ;;  %v22_v12 = vld [vmem:[%s434_s1 + $0x30] sm:$0xff]  ;;  %v23_v13 = vld [vmem:[%s434_s1 + $0x38] sm:$0xff]  ;;  %v24_v15 = vld [vmem:[%s434_s1 + $0x40] sm:$0xff] }
   0x8   :  { %v269_v14 = vpack.c.bf16 %v23_v13, %v22_v12  ;;  %v25_v16 = vld [vmem:[%s434_s1 + $0x48] sm:$0xff]  ;;  %v26_v18 = vld [vmem:[%s434_s1 + $0x50] sm:$0xff]  ;;  %v27_v19 = vld [vmem:[%s434_s1 + $0x58] sm:$0xff] }
   0x9   :  { %v273_v17 = vpack.c.bf16 %v25_v16, %v24_v15  ;;  %v277_v20 = vpack.c.bf16 %v27_v19, %v26_v18  ;;  %v28_v21 = vld [vmem:[%s434_s1 + $0x60] sm:$0xff]  ;;  %v29_v22 = vld [vmem:[%s434_s1 + $0x68] sm:$0xff]  ;;  %v30_v24 = vld [vmem:[%s434_s1 + $0x70] sm:$0xff] }
   0xa   :  { %v281_v23 = vpack.c.bf16 %v29_v22, %v28_v21  ;;  %v31_v25 = vld [vmem:[%s434_s1 + $0x78] sm:$0xff]  ;;  %v15_v27 = vld [vmem:[%s433_s0] sm:$0xff]  ;;  %s323_s0 = smov [#allocation2]  }
   0xb   :  { %v285_v26 = vpack.c.bf16 %v31_v25, %v30_v24  ;;  %v186_v28 = vld [vmem:[%s435_s2] ss:$0 sm:$0xff]  ;;  %s178_s1 = sshll.u32 %s323_s0, 4  ;;  %s179_s1 = int_to_ptr.vmem [resolvable:$true] %s178_s1 }
   0xc   :  { %263 = vmatpush3.bf16.xpose.msk.msra.mxu0 %vm352_vm1, %v261_v8  ;;  %s296_s2 = scalar_lea.vmem %s179_s1, 128  ;;  %p301_p1 = scmp.lt.s32.totalorder %s179_s1, %s179_s1 }
   0xd   :  { %264 = vmatprep.subr.bf16.mxu0 %v320_v2  ;;  %p297_p0 = scmp.ne.s32.totalorder %s179_s1, %s296_s2  ;;  %p302_p2 = scmp.lt.s32.totalorder %s296_s2, %s296_s2 }
   0xf   :  { %p303_p3 = por %p302_p2, %p301_p1 }
  0x11   :  { %p304_p4 = pnand %p303_p3, %p297_p0 }
  0x14   :  { %267 = vmatpush3.bf16.xpose.msk.msra.mxu0 %vm352_vm1, %v265_v11 }
  0x15   :  { %268 = vmatprep.subr.bf16.mxu0 %v320_v2 }
  0x1c   :  { %271 = vmatpush3.bf16.xpose.msk.msra.mxu0 %vm352_vm1, %v269_v14 }
  0x1d   :  { %272 = vmatprep.subr.bf16.mxu0 %v320_v2 }
  0x24   :  { %275 = vmatpush3.bf16.xpose.msk.msra.mxu0 %vm352_vm1, %v273_v17 }
  0x25   :  { %276 = vmatprep.subr.bf16.mxu0 %v320_v2 }
  0x2c   :  { %279 = vmatpush3.bf16.xpose.msk.msra.mxu0 %vm352_vm1, %v277_v20 }
  0x2d   :  { %280 = vmatprep.subr.bf16.mxu0 %v320_v2 }
  0x34   :  { %283 = vmatpush3.bf16.xpose.msk.msra.mxu0 %vm352_vm1, %v281_v23 }
  0x35   :  { %284 = vmatprep.subr.bf16.mxu0 %v320_v2 }
  0x3c   :  { %287 = vmatpush3.bf16.xpose.msk.msra.mxu0 %vm352_vm1, %v285_v26 }
  0x43   :  { %254 = vmatmul.mubr.msk.f32.vlgmr.msra.gmra.mrb[0].mxu0 %vm39_vm0, %v15_v27 }
 0x116   :  { %v157_v29 = vpop.f32.mrb[0].mxu0 }
 0x117   :  { %v158_v30 = vadd.f32 %v186_v28, %v157_v29  ;;  %v255_v31 = vpop.f32.mrb[1].mxu0 }
 0x119   :  { %161 = vmax.xlane.f32.xlu0 %v158_v30 }
 0x1a6   :  { %v162_v32 = vpop.xlane.xlu0 %161 }
 0x1a7   :  { %v163_v33 = vsub.f32 %v158_v30, %v162_v32 }
 0x1a9   :  { %v164_v34 = vmul.f32 1.442695, %v163_v33 }
 0x1ab   :  { %292 = vpow2.f32 %v164_v34 }
 0x1b5   :  { %v293_v35 = vpop.eup %292 }
 0x1b6   :  { %166 = vadd.xlane.f32.xlu0 %v293_v35 }
 0x243   :  { %v167_v36 = vpop.xlane.xlu0 %166 }
 0x244   :  { %294 = vlog2.f32 %v167_v36 }
 0x24e   :  { %v295_v37 = vpop.eup %294 }
 0x24f   :  { %v169_v38 = vmul.f32 0.6931472, %v295_v37 }
 0x251   :  { %v170_v39 = vsub.f32 %v163_v33, %v169_v38 }
 0x253   :  { %171 = vst [vmem:[#allocation2] sm:$0xff] %v170_v39 }
 0x254   :  { %307 = shalt.err (!%p304_p4)
}
 0x255   :  { %s308_s23 = scalar_lea.hbm %s436_s3, 128 }
 0x256   :  { %p309_p5 = scmp.ne.s32.totalorder %s436_s3, %s308_s23  ;;  %p312_p6 = scmp.lt.u32.totalorder %s308_s23, %s436_s3 }
 0x258   :  { %p314_p7 = pnand %p312_p6, %p309_p5 }
 0x25a   :  { %317 = shalt.err (!%p314_p7)
}
 0x25b   :  { %181 = dma.vmem_to_hbm [thread:$0]  %s179_s1, 128, %s436_s3, [#allocation3]  }
 0x25c   :  { %318 = dma.done.wait [#allocation3], 128  }
 0x25d   :  { %319 = vsyncadd [#allocation3], 4294967168 }
 0x25e   :  { %185 = vsyncpa [#allocation3], 1 }

</bundles_post_ra>
